<compile_context>
chip_gen: v6e
topology: v6e:2x2x1
jax: 0.10.0
libtpu: 0.0.40
codegen_flags: <defaults>
</compile_context>

<pallas_src>
import jax
import jax.numpy as jnp
from jax.experimental import pallas as pl
from jax.experimental.pallas import tpu as pltpu

IMAGE_DIM = 28 * 28 * 1   # 784
H1 = 128
H2 = 64
OUT = 1

# Batch tile (rows).  f32 x double buffer at 4096 rows is ~25.7 MiB; with the
# in-kernel bf16 copy, h1/h2 temps, resident weights and the (TB,1) output
# buffers the total stays ~45 MiB -- inside v5e/v6e 128 MiB and v7x 64 MiB VMEM.
DEFAULT_TB = 4096


def _leaky_relu(x, slope=0.1):
    return jnp.where(x > 0, x, slope * x)


def _round_up(x, m):
    return ((x + m - 1) // m) * m


def _choose_tb(B, tb_max):
    """Pick the batch tile: tiny batches get one minimal (multiple-of-8) tile;
    larger batches split into >=2 tiles so the 'parallel' grid axis can feed
    both v7x TensorCores, capped at the VMEM-sized tile."""
    if B < 512:
        return _round_up(B, 8)
    return min(tb_max, max(256, _round_up(pl.cdiv(B, 2), 256)))


def _vmem_limit_bytes(tb):
    """Right-sized scoped-VMEM budget for one grid step (double-buffered f32 x,
    in-kernel bf16 copy, h1/h2 temps, lane-padded (tb,1) output buffers) plus
    resident weights and fixed headroom.  Capped below v7x's 64 MiB/TC."""
    per_row = (IMAGE_DIM * 4 * 2      # x f32, double-buffered
               + IMAGE_DIM * 2        # in-kernel bf16 copy of x
               + H1 * (4 + 2)         # h1 f32 + bf16 recast
               + 128 * 4 * 2          # h2 f32 + w3-product (lane-padded to 128)
               + 128 * 4 * 2)         # (tb,1) f32 reduce result + output dbuf (lane-padded)
    est = tb * per_row + (2 << 20)    # + double-buffered weights/biases + misc
    return min(_round_up(est, 1 << 20) + (8 << 20), 56 << 20)


def disc_kernel(x_ref, w1_ref, b1_ref, w2_ref, b2_ref, w3_ref, b3_ref, o_ref):
    # Cast f32 -> bf16 on the VPU (ample slack under the x DMA), then MXU dot
    # with f32 accumulation.  Layer 1: (TB, 784) @ (784, 128).
    x = x_ref[...].astype(jnp.bfloat16)
    h = jnp.dot(x, w1_ref[...], preferred_element_type=jnp.float32)
    h = _leaky_relu(h + b1_ref[...])
    # Layer 2: (TB, 128) @ (128, 64), f32 accumulate.
    h = jnp.dot(h.astype(jnp.bfloat16), w2_ref[...],
                preferred_element_type=jnp.float32)
    h = _leaky_relu(h + b2_ref[...])
    # Layer 3 (N=1): VPU multiply by the (1, 64) weight row + XLU lane reduce.
    h = jnp.sum(h * w3_ref[...], axis=-1, keepdims=True)
    o_ref[...] = jax.nn.sigmoid(h + b3_ref[...]).astype(o_ref.dtype)


def discriminator_forward(x, params, tb=DEFAULT_TB):
    """x: (B, IMAGE_DIM) float32 -> (B, 1) float32."""
    w1, b1, w2, b2, w3, b3 = params
    B = x.shape[0]

    tb_eff = _choose_tb(B, tb)
    n_tiles = pl.cdiv(B, tb_eff)          # ragged last tile handled by DMA clipping

    # Weights / biases: constant block index across grid steps => fetched once,
    # kept VMEM-resident (no re-DMA per batch tile).
    const = lambda shape: pl.BlockSpec(shape, lambda i: (0,) * len(shape))

    cost = pl.CostEstimate(
        flops=2 * B * (IMAGE_DIM * H1 + H1 * H2 + H2),
        transcendentals=B,  # sigmoid
        bytes_accessed=(B * IMAGE_DIM * 4                      # x (f32, read once)
                        + (IMAGE_DIM * H1 + H1 * H2) * 2       # bf16 weights
                        + (H1 + H2 + H2 + 1) * 4               # biases + w3 row
                        + B * OUT * 4),                        # output
    )

    out = pl.pallas_call(
        disc_kernel,
        out_shape=jax.ShapeDtypeStruct((B, OUT), jnp.float32),
        grid_spec=pltpu.PrefetchScalarGridSpec(
            num_scalar_prefetch=0,
            grid=(n_tiles,),
            in_specs=[
                pl.BlockSpec((tb_eff, IMAGE_DIM), lambda i: (i, 0)),  # x (streamed f32)
                const(w1.shape), const(b1.shape),
                const(w2.shape), const(b2.shape),
                const(w3.shape), const(b3.shape),
            ],
            out_specs=pl.BlockSpec((tb_eff, OUT), lambda i: (i, 0)),
        ),
        compiler_params=pltpu.CompilerParams(
            dimension_semantics=("parallel",),                 # shard batch tiles across TCs
            vmem_limit_bytes=_vmem_limit_bytes(tb_eff),        # right-sized per tile
        ),
        cost_estimate=cost,
    )(x, w1, b1, w2, b2, w3, b3)

    return out


def init_params(key):
    """Deterministic init matching the nn.Linear shapes (stored as (in, out)).

    Matmul weights are stored in bf16 (MXU-native streaming dtype); biases and
    the final (1, 64) row-weight stay f32 (epilogue runs on the VPU in f32)."""
    k1, k2, k3, k4, k5, k6 = jax.random.split(key, 6)

    def lin(kw, kb, fan_in, fan_out):
        bound = 1.0 / jnp.sqrt(fan_in)
        w = jax.random.uniform(kw, (fan_in, fan_out), jnp.float32, -bound, bound)
        b = jax.random.uniform(kb, (1, fan_out), jnp.float32, -bound, bound)
        return w, b

    w1, b1 = lin(k1, k2, IMAGE_DIM, H1)
    w2, b2 = lin(k3, k4, H1, H2)
    w3, b3 = lin(k5, k6, H2, OUT)
    return (
        w1.astype(jnp.bfloat16), b1,
        w2.astype(jnp.bfloat16), b2,
        w3.reshape(1, H2),       b3.reshape(1, 1),   # w3 as a lane row for the VPU reduce
    )


def reference_forward(x, params):
    """Pure-JAX reference with the same bf16-inputs / f32-accumulate recipe."""
    w1, b1, w2, b2, w3, b3 = params
    xb = x.astype(jnp.bfloat16)
    h = _leaky_relu(jnp.dot(xb, w1, preferred_element_type=jnp.float32) + b1)
    h = _leaky_relu(jnp.dot(h.astype(jnp.bfloat16), w2,
                            preferred_element_type=jnp.float32) + b2)
    h = jnp.sum(h * w3, axis=-1, keepdims=True) + b3
    return jax.nn.sigmoid(h)


if __name__ == "__main__":
    key = jax.random.PRNGKey(0)
    kx, kp = jax.random.split(key)
    params = init_params(kp)

    # Tile-aligned small batch.
    B = 8
    x = jax.random.normal(kx, (B, IMAGE_DIM), jnp.float32)
    out = jax.block_until_ready(discriminator_forward(x, params))
    ref = reference_forward(x, params)
    assert out.shape == (B, OUT), out.shape
    assert jnp.allclose(out, ref, atol=2e-3, rtol=2e-3), "mismatch vs JAX reference (B=8)"

    # Ragged batch (not a multiple of the tile) -> exercises the no-pad,
    # DMA-clipped edge-block path.
    B2 = 13
    x2 = jax.random.normal(kx, (B2, IMAGE_DIM), jnp.float32)
    out2 = jax.block_until_ready(discriminator_forward(x2, params))
    ref2 = reference_forward(x2, params)
    assert out2.shape == (B2, OUT), out2.shape
    assert jnp.allclose(out2, ref2, atol=2e-3, rtol=2e-3), "mismatch vs JAX reference (B=13)"

    print("KERNEL_OK")
</pallas_src>

<mosaic_0001>
module attributes {stable_mosaic.version = 11 : i64} {
  func.func @disc_kernel(%arg0: i32, %arg1: memref<8x784xf32, #tpu.memory_space<vmem>>, %arg2: memref<784x128xbf16, #tpu.memory_space<vmem>>, %arg3: memref<1x128xf32, #tpu.memory_space<vmem>>, %arg4: memref<128x64xbf16, #tpu.memory_space<vmem>>, %arg5: memref<1x64xf32, #tpu.memory_space<vmem>>, %arg6: memref<1x64xf32, #tpu.memory_space<vmem>>, %arg7: memref<1x1xf32, #tpu.memory_space<vmem>>, %arg8: memref<8x1xf32, #tpu.memory_space<vmem>>) attributes {dimension_semantics = [#tpu.dimension_semantics<parallel>], iteration_bounds = array<i64: 1>, scalar_prefetch = 0 : i64, scratch_operands = 0 : i64, tpu.core_type = #tpu.core_type<tc>, window_params = [{transform_indices = @transform_0, window_bounds = array<i64: 8, 784>}, {pipeline_mode = #tpu.pipeline_mode<synchronous>, transform_indices = @transform_1, window_bounds = array<i64: 784, 128>}, {pipeline_mode = #tpu.pipeline_mode<synchronous>, transform_indices = @transform_2, window_bounds = array<i64: 1, 128>}, {pipeline_mode = #tpu.pipeline_mode<synchronous>, transform_indices = @transform_3, window_bounds = array<i64: 128, 64>}, {pipeline_mode = #tpu.pipeline_mode<synchronous>, transform_indices = @transform_4, window_bounds = array<i64: 1, 64>}, {pipeline_mode = #tpu.pipeline_mode<synchronous>, transform_indices = @transform_5, window_bounds = array<i64: 1, 64>}, {pipeline_mode = #tpu.pipeline_mode<synchronous>, transform_indices = @transform_6, window_bounds = array<i64: 1, 1>}, {transform_indices = @transform_7, window_bounds = array<i64: 8, 1>}]} {
    %c0 = arith.constant 0 : index
    %c0_0 = arith.constant 0 : index
    %0 = vector.load %arg1[%c0, %c0_0] : memref<8x784xf32, #tpu.memory_space<vmem>>, vector<8x784xf32>
    %1 = arith.truncf %0 : vector<8x784xf32> to vector<8x784xbf16>
    %c0_1 = arith.constant 0 : index
    %c0_2 = arith.constant 0 : index
    %2 = vector.load %arg2[%c0_1, %c0_2] : memref<784x128xbf16, #tpu.memory_space<vmem>>, vector<784x128xbf16>
    %cst = arith.constant dense<0.000000e+00> : vector<8x128xf32>
    %3 = tpu.matmul %1, %2, %cst {dimension_numbers = #tpu.dot_dimension_numbers<[1], [0], [0], [1], [0, 0, 1, 1], [], []>} : vector<8x784xbf16>, vector<784x128xbf16>, vector<8x128xf32> -> vector<8x128xf32>
    %c0_3 = arith.constant 0 : index
    %c0_4 = arith.constant 0 : index
    %4 = vector.load %arg3[%c0_3, %c0_4] : memref<1x128xf32, #tpu.memory_space<vmem>>, vector<1x128xf32>
    %5 = vector.broadcast %4 : vector<1x128xf32> to vector<8x128xf32>
    %6 = arith.addf %3, %5 : vector<8x128xf32>
    %cst_5 = arith.constant 0.000000e+00 : f32
    %7 = vector.broadcast %cst_5 : f32 to vector<8x128xf32>
    %8 = arith.cmpf ogt, %6, %7 : vector<8x128xf32>
    %cst_6 = arith.constant 1.000000e-01 : f32
    %9 = vector.broadcast %cst_6 : f32 to vector<8x128xf32>
    %10 = arith.mulf %9, %6 : vector<8x128xf32>
    %11 = arith.select %8, %6, %10 : vector<8x128xi1>, vector<8x128xf32>
    %12 = arith.truncf %11 : vector<8x128xf32> to vector<8x128xbf16>
    %c0_7 = arith.constant 0 : index
    %c0_8 = arith.constant 0 : index
    %13 = vector.load %arg4[%c0_7, %c0_8] : memref<128x64xbf16, #tpu.memory_space<vmem>>, vector<128x64xbf16>
    %cst_9 = arith.constant dense<0.000000e+00> : vector<8x64xf32>
    %14 = tpu.matmul %12, %13, %cst_9 {dimension_numbers = #tpu.dot_dimension_numbers<[1], [0], [0], [1], [0, 0, 1, 1], [], []>} : vector<8x128xbf16>, vector<128x64xbf16>, vector<8x64xf32> -> vector<8x64xf32>
    %c0_10 = arith.constant 0 : index
    %c0_11 = arith.constant 0 : index
    %15 = vector.load %arg5[%c0_10, %c0_11] : memref<1x64xf32, #tpu.memory_space<vmem>>, vector<1x64xf32>
    %16 = vector.broadcast %15 : vector<1x64xf32> to vector<8x64xf32>
    %17 = arith.addf %14, %16 : vector<8x64xf32>
    %cst_12 = arith.constant 0.000000e+00 : f32
    %18 = vector.broadcast %cst_12 : f32 to vector<8x64xf32>
    %19 = arith.cmpf ogt, %17, %18 : vector<8x64xf32>
    %cst_13 = arith.constant 1.000000e-01 : f32
    %20 = vector.broadcast %cst_13 : f32 to vector<8x64xf32>
    %21 = arith.mulf %20, %17 : vector<8x64xf32>
    %22 = arith.select %19, %17, %21 : vector<8x64xi1>, vector<8x64xf32>
    %c0_14 = arith.constant 0 : index
    %c0_15 = arith.constant 0 : index
    %23 = vector.load %arg6[%c0_14, %c0_15] : memref<1x64xf32, #tpu.memory_space<vmem>>, vector<1x64xf32>
    %24 = vector.broadcast %23 : vector<1x64xf32> to vector<8x64xf32>
    %25 = arith.mulf %22, %24 : vector<8x64xf32>
    %cst_16 = arith.constant dense<0.000000e+00> : vector<8xf32>
    %26 = vector.multi_reduction <add>, %25, %cst_16 [1] : vector<8x64xf32> to vector<8xf32>
    %27 = vector.shape_cast %26 : vector<8xf32> to vector<8x1xf32>
    %c0_17 = arith.constant 0 : index
    %c0_18 = arith.constant 0 : index
    %28 = vector.load %arg7[%c0_17, %c0_18] : memref<1x1xf32, #tpu.memory_space<vmem>>, vector<1x1xf32>
    %29 = vector.broadcast %28 : vector<1x1xf32> to vector<8x1xf32>
    %30 = arith.addf %27, %29 : vector<8x1xf32>
    %31 = arith.negf %30 : vector<8x1xf32>
    %32 = math.exp %31 : vector<8x1xf32>
    %cst_19 = arith.constant 1.000000e+00 : f32
    %33 = vector.broadcast %cst_19 : f32 to vector<8x1xf32>
    %34 = arith.addf %33, %32 : vector<8x1xf32>
    %35 = arith.divf %33, %34 : vector<8x1xf32>
    %c0_20 = arith.constant 0 : index
    %c0_21 = arith.constant 0 : index
    %36 = vector.load %arg8[%c0_20, %c0_21] : memref<8x1xf32, #tpu.memory_space<vmem>>, vector<8x1xf32>
    tpu.vector_store %arg8[%c0_20, %c0_21], %35 {strides = array<i32>} : memref<8x1xf32, #tpu.memory_space<vmem>>, vector<8x1xf32>,
    return
  }
  func.func @transform_0(%arg0: i32) -> (i32, i32) {
    %c0_i32 = arith.constant 0 : i32
    %c0_i32_0 = arith.constant 0 : i32
    return %arg0, %c0_i32 : i32, i32
  }
  func.func @transform_1(%arg0: i32) -> (i32, i32) {
    %c0_i32 = arith.constant 0 : i32
    %c0_i32_0 = arith.constant 0 : i32
    %c0_i32_1 = arith.constant 0 : i32
    return %c0_i32, %c0_i32_0 : i32, i32
  }
  func.func @transform_2(%arg0: i32) -> (i32, i32) {
    %c0_i32 = arith.constant 0 : i32
    %c0_i32_0 = arith.constant 0 : i32
    %c0_i32_1 = arith.constant 0 : i32
    return %c0_i32, %c0_i32_0 : i32, i32
  }
  func.func @transform_3(%arg0: i32) -> (i32, i32) {
    %c0_i32 = arith.constant 0 : i32
    %c0_i32_0 = arith.constant 0 : i32
    %c0_i32_1 = arith.constant 0 : i32
    return %c0_i32, %c0_i32_0 : i32, i32
  }
  func.func @transform_4(%arg0: i32) -> (i32, i32) {
    %c0_i32 = arith.constant 0 : i32
    %c0_i32_0 = arith.constant 0 : i32
    %c0_i32_1 = arith.constant 0 : i32
    return %c0_i32, %c0_i32_0 : i32, i32
  }
  func.func @transform_5(%arg0: i32) -> (i32, i32) {
    %c0_i32 = arith.constant 0 : i32
    %c0_i32_0 = arith.constant 0 : i32
    %c0_i32_1 = arith.constant 0 : i32
    return %c0_i32, %c0_i32_0 : i32, i32
  }
  func.func @transform_6(%arg0: i32) -> (i32, i32) {
    %c0_i32 = arith.constant 0 : i32
    %c0_i32_0 = arith.constant 0 : i32
    %c0_i32_1 = arith.constant 0 : i32
    return %c0_i32, %c0_i32_0 : i32, i32
  }
  func.func @transform_7(%arg0: i32) -> (i32, i32) {
    %c0_i32 = arith.constant 0 : i32
    %c0_i32_0 = arith.constant 0 : i32
    return %arg0, %c0_i32 : i32, i32
  }
}

</mosaic_0001>

<bundles_post_ra>
// kernel: tpu_custom_call.1
= control target key start
LH: loop header
LB: loop body
LE: loop exit
PB: predicated region body
PF: predicated region fallthrough
CT: control target
= control target key end

     0   :  { %s1146_s0 = inlined_call_operand.vmem [shape: f32[8,784], index: 0, kind: input, shape index: {}]   ;;  %s1147_s1 = inlined_call_operand.hbm [shape: bf16[784,128], index: 1, kind: input, shape index: {}]   ;;  %s1148_s2 = inlined_call_operand.vmem [shape: f32[1,128], index: 2, kind: input, shape index: {}]   ;;  %s1149_s3 = inlined_call_operand.vmem [shape: bf16[128,64], index: 3, kind: input, shape index: {}]   ;;  %s1150_s4 = inlined_call_operand.vmem [shape: f32[1,64], index: 4, kind: input, shape index: {}]   ;;  %s1151_s5 = inlined_call_operand.vmem [shape: f32[1,64], index: 5, kind: input, shape index: {}]   ;;  %s1152_s6 = inlined_call_operand.<no memory space> [shape: f32[1,1], index: 6, kind: input, shape index: {}]   ;;  %s1153_s7 = inlined_call_operand.vmem [shape: f32[8,1], index: 7, kind: output, shape index: {}]  }
   0x1   :  { %v12_v0 = vstv %s1152_s6 }
   0x2   :  { %13 = vst [vmem:[#allocation2] sm:$0x1] %v12_v0 }
   0x3   :  { %14 = vsyncpa [#allocation4], 0  ;;  %s1025_s26 = smov [#allocation3]  }
   0x4   :  { %s22_s27 = sshll.u32 %s1025_s26, 4  ;;  %s23_s27 = int_to_ptr.vmem [resolvable:$true] %s22_s27 }
   0x5   :  { %s1011_s28 = scalar_lea.vmem %s23_s27, 6272  ;;  %p1016_p1 = scmp.lt.s32.totalorder %s23_s27, %s23_s27 }
   0x6   :  { %p1012_p0 = scmp.ne.s32.totalorder %s23_s27, %s1011_s28  ;;  %p1017_p2 = scmp.lt.s32.totalorder %s1011_s28, %s1011_s28 }
   0x8   :  { %p1018_p3 = por %p1017_p2, %p1016_p1 }
   0xa   :  { %p1019_p4 = pnand %p1018_p3, %p1012_p0 }
   0xc   :  { %1022 = shalt.err (!%p1019_p4)
}
   0xd   :  { %s1026_s29 = smov 64   ;;  %s1027_s30 = smov 4  }
   0xe   :  { %28 = dma.hbm_to_vmem [thread:$0]  %s1147_s1, 6272, %s23_s27, [#allocation4], %s1026_s29, %s1026_s29, %s1027_s30  }
   0xf   :  { %1023 = dma.done.wait [#allocation4], 6272  }
  0x10   :  { %1024 = vsyncadd [#allocation4], 4294961024  ;;  %v942_v1 = vld [vmem:[#allocation3 + $0x78] sm:$0xff]   ;;  %v946_v5 = vld [vmem:[#allocation3 + $0x70] sm:$0xff]   ;;  %v1028_v45 = vmov 0.0   ;;  %vm1029_vm0 = vmmov 0  }
  0x11   :  { %v943_v2 = vld [vmem:[#allocation3 + $0x38] sm:$0xff]   ;;  %834 = vmatprep.subr.bf16.mxu0 %v942_v1  ;;  %v947_v6 = vld [vmem:[#allocation3 + $0x30] sm:$0xff]   ;;  %v950_v9 = vld [vmem:[#allocation3 + $0x68] sm:$0xff]   ;;  %vm456_vm1 = vcmask 130048   ;;  %vm746_vm4 = vcmask 523264   ;;  %vm764_vm5 = vcmask 7168  }
  0x12   :  { %v944_v3 = vld [vmem:[#allocation3 + $0xf8] sm:$0xff]   ;;  %835 = vmatpush3.bf16.msra.mxu0 %v943_v2  ;;  %v948_v7 = vld [vmem:[#allocation3 + $0xf0] sm:$0xff]   ;;  %v951_v10 = vld [vmem:[#allocation3 + $0x28] sm:$0xff]  }
  0x13   :  { %v945_v4 = vld [vmem:[#allocation3 + $0xb8] sm:$0xff]   ;;  %856 = vmatprep.subr.bf16.mxu1 %v944_v3  ;;  %836 = vmatprep.subr.bf16.mxu0 %v946_v5  ;;  %v949_v8 = vld [vmem:[#allocation3 + $0xb0] sm:$0xff]   ;;  %v952_v11 = vld [vmem:[#allocation3 + $0xe8] sm:$0xff]  }
  0x14   :  { %857 = vmatpush3.bf16.msra.mxu1 %v945_v4  ;;  %v953_v12 = vld [vmem:[#allocation3 + $0xa8] sm:$0xff]   ;;  %v954_v13 = vld [vmem:[#allocation3 + $0x60] sm:$0xff]   ;;  %v958_v17 = vld [vmem:[#allocation3 + $0x58] sm:$0xff]  }
  0x15   :  { %858 = vmatprep.subr.bf16.mxu1 %v948_v7  ;;  %v955_v14 = vld [vmem:[#allocation3 + $0x20] sm:$0xff]   ;;  %v959_v18 = vld [vmem:[#allocation3 + $0x18] sm:$0xff]   ;;  %v962_v21 = vld [vmem:[#allocation3 + $0x50] sm:$0xff]  }
  0x16   :  { %837 = vmatpush3.bf16.msra.mxu0 %v947_v6  ;;  %v956_v15 = vld [vmem:[#allocation3 + $0xe0] sm:$0xff]   ;;  %v960_v19 = vld [vmem:[#allocation3 + $0xd8] sm:$0xff]   ;;  %v963_v22 = vld [vmem:[#allocation3 + $0x10] sm:$0xff]  }
  0x17   :  { %838 = vmatprep.subr.bf16.mxu0 %v950_v9  ;;  %v957_v16 = vld [vmem:[#allocation3 + $0xa0] sm:$0xff]   ;;  %v961_v20 = vld [vmem:[#allocation3 + $0x98] sm:$0xff]   ;;  %v964_v23 = vld [vmem:[#allocation3 + $0xd0] sm:$0xff]  }
  0x18   :  { %859 = vmatpush3.bf16.msra.mxu1 %v949_v8  ;;  %v965_v24 = vld [vmem:[#allocation3 + $0x90] sm:$0xff]   ;;  %v966_v25 = vld [vmem:[#allocation3 + $0x48] sm:$0xff]   ;;  %v970_v29 = vld [vmem:[#allocation3 + $0x40] sm:$0xff]  }
  0x19   :  { %860 = vmatprep.subr.bf16.mxu1 %v952_v11  ;;  %v967_v26 = vld [vmem:[#allocation3 + $0x8] sm:$0xff]   ;;  %v971_v30 = vld [vmem:[#allocation3] sm:$0xff]   ;;  %v974_v37 = vld [vmem:[#allocation3 + $0x178] sm:$0xff]  }
  0x1a   :  { %839 = vmatpush3.bf16.msra.mxu0 %v951_v10  ;;  %v968_v27 = vld [vmem:[#allocation3 + $0xc8] sm:$0xff]   ;;  %v972_v31 = vld [vmem:[#allocation3 + $0xc0] sm:$0xff]   ;;  %v46_v38 = vld [vmem:[%s1146_s0 + $0x18] sm:$0xff] }
  0x1b   :  { %840 = vmatprep.subr.bf16.mxu0 %v954_v13  ;;  %v969_v28 = vld [vmem:[#allocation3 + $0x88] sm:$0xff]   ;;  %v973_v34 = vld [vmem:[#allocation3 + $0x80] sm:$0xff]   ;;  %v53_v39 = vpack.c.bf16 %v46_v38, %v46_v38  ;;  %v975_v40 = vld [vmem:[#allocation3 + $0x138] sm:$0xff]  }
  0x1c   :  { %861 = vmatpush3.bf16.msra.mxu1 %v953_v12  ;;  %v44_v32 = vld [vmem:[%s1146_s0 + $0x8] sm:$0xff]  ;;  %v43_v35 = vld [vmem:[%s1146_s0] sm:$0xff]  ;;  %v45_v41 = vld [vmem:[%s1146_s0 + $0x10] sm:$0xff] }
  0x1d   :  { %862 = vmatprep.subr.bf16.mxu1 %v956_v15  ;;  %v51_v33 = vpack.c.bf16 %v44_v32, %v44_v32  ;;  %v50_v36 = vpack.c.bf16 %v43_v35, %v43_v35  ;;  %532 = vmatprep.mubr.bf16.mxu1 %v53_v39  ;;  %v52_v42 = vpack.c.bf16 %v45_v41, %v45_v41  ;;  %v976_v43 = vld [vmem:[#allocation3 + $0x170] sm:$0xff]   ;;  %v978_v46 = vld [vmem:[#allocation3 + $0x168] sm:$0xff]   ;;  %v980_v48 = vld [vmem:[#allocation3 + $0x160] sm:$0xff]  }
  0x1e   :  { %841 = vmatpush3.bf16.msra.mxu0 %v955_v14  ;;  %v977_v44 = vld [vmem:[#allocation3 + $0x130] sm:$0xff]   ;;  %v979_v47 = vld [vmem:[#allocation3 + $0x128] sm:$0xff]   ;;  %v981_v49 = vld [vmem:[#allocation3 + $0x120] sm:$0xff]  }
  0x1f   :  { %842 = vmatprep.subr.bf16.mxu0 %v958_v17  ;;  %492 = vmatprep.mubr.bf16.mxu0 %v51_v33  ;;  %v982_v50 = vld [vmem:[#allocation3 + $0x158] sm:$0xff]   ;;  %v984_v52 = vld [vmem:[#allocation3 + $0x150] sm:$0xff]   ;;  %v990_v54 = vld [vmem:[#allocation3 + $0x180] sm:$0xff]  }
  0x20   :  { %863 = vmatpush3.bf16.msra.mxu1 %v957_v16  ;;  %v983_v51 = vld [vmem:[#allocation3 + $0x118] sm:$0xff]   ;;  %v985_v53 = vld [vmem:[#allocation3 + $0x110] sm:$0xff]   ;;  %v48_v55 = vld [vmem:[%s1146_s0 + $0x28] sm:$0xff] }
  0x21   :  { %864 = vmatprep.subr.bf16.mxu1 %v960_v19  ;;  %v986_v56 = vld [vmem:[#allocation3 + $0x148] sm:$0xff]   ;;  %v55_v57 = vpack.c.bf16 %v48_v55, %v48_v55  ;;  %v988_v61 = vld [vmem:[#allocation3 + $0x140] sm:$0xff]   ;;  %v991_v1 = vld [vmem:[%s1149_s3 + $0x38] sm:$0xff]  }
  0x22   :  { %843 = vmatpush3.bf16.msra.mxu0 %v959_v18  ;;  %v49_v58 = vld [vmem:[%s1146_s0 + $0x30] sm:$0xff]  ;;  %v989_v62 = vld [vmem:[#allocation3 + $0x100] sm:$0xff]   ;;  %v995_v5 = vld [vmem:[%s1149_s3 + $0x18] sm:$0xff]  }
  0x23   :  { %844 = vmatprep.subr.bf16.mxu0 %v962_v21  ;;  %v56_v59 = vpack.c.bf16 %v49_v58, %v49_v58  ;;  %v987_v60 = vld [vmem:[#allocation3 + $0x108] sm:$0xff]   ;;  %v47_v63 = vld [vmem:[%s1146_s0 + $0x20] sm:$0xff] }
  0x24   :  { %865 = vmatpush3.bf16.msra.mxu1 %v961_v20  ;;  %v54_v0 = vpack.c.bf16 %v47_v63, %v47_v63  ;;  %v992_v2 = vld [vmem:[%s1149_s3 + $0x30] sm:$0xff]   ;;  %v993_v3 = vld [vmem:[%s1149_s3 + $0x28] sm:$0xff]   ;;  %v994_v4 = vld [vmem:[%s1149_s3 + $0x20] sm:$0xff]  }
  0x25   :  { %866 = vmatprep.subr.bf16.mxu1 %v964_v23  ;;  %v996_v6 = vld [vmem:[%s1149_s3 + $0x10] sm:$0xff]   ;;  %v997_v7 = vld [vmem:[%s1149_s3 + $0x8] sm:$0xff]   ;;  %v998_v8 = vld [vmem:[%s1149_s3] sm:$0xff]  }
  0x26   :  { %845 = vmatpush3.bf16.msra.mxu0 %v963_v22  ;;  %v771_v22 = vld [vmem:[%s1148_s2] ss:$0 sm:$0xff] }
  0x27   :  { %846 = vmatprep.subr.bf16.mxu0 %v966_v25  ;;  %v831_v41 = vld [vmem:[%s1151_s5] ss:$0 sm:$0xff] }
  0x28   :  { %867 = vmatpush3.bf16.msra.mxu1 %v965_v24 }
  0x29   :  { %868 = vmatprep.subr.bf16.mxu1 %v968_v27 }
  0x2a   :  { %847 = vmatpush3.bf16.msra.mxu0 %v967_v26 }
  0x2b   :  { %848 = vmatprep.subr.bf16.mxu0 %v970_v29 }
  0x2c   :  { %869 = vmatpush3.bf16.msra.mxu1 %v969_v28 }
  0x2d   :  { %870 = vmatprep.subr.bf16.mxu1 %v972_v31 }
  0x2e   :  { %849 = vmatpush3.bf16.msra.mxu0 %v971_v30 }
  0x2f   :  { %878 = vmatprep.subr.bf16.mxu0 %v974_v37 }
  0x30   :  { %871 = vmatpush3.bf16.msra.mxu1 %v973_v34 }
  0x31   :  { %493 = vmatmul.mubr.bf16.vlgmr.msra.gmra.mxu0 %v50_v36  ;;  %911 = vmatprep.subr.bf16.mxu1 %v1028_v45  ;;  %v822_v36 = vld [vmem:[%s1150_s4] ss:$0 sm:$0xff] }
  0x32   :  { %879 = vmatpush3.bf16.msra.mxu0 %v975_v40  ;;  %572 = vmatprep.mubr.bf16.mxu0 %v55_v57 }
  0x33   :  { %533 = vmatmul.mubr.bf16.vlgmr.msra.gmra.mxu1 %v52_v42  ;;  %880 = vmatprep.subr.bf16.mxu0 %v976_v43 }
  0x34   :  { %913 = vmatprep.mubr.msk.bf16.mxu1 %vm1029_vm0, %v1028_v45  ;;  %912 = vmatpush3.bf16.msra.mxu1 %v990_v54 }
  0x35   :  { %917 = vmatprep.subr.bf16.mxu1 %v1028_v45 }
  0x36   :  { %881 = vmatpush3.bf16.msra.mxu0 %v977_v44 }
  0x37   :  { %882 = vmatprep.subr.bf16.mxu0 %v978_v46 }
  0x3a   :  { %883 = vmatpush3.bf16.msra.mxu0 %v979_v47  ;;  %v832_v47 = vld [vmem:[#allocation2] ss:$0 sm:$0xff] }
  0x3b   :  { %884 = vmatprep.subr.bf16.mxu0 %v980_v48  ;;  %914 = vmatmul.mubr.msk.bf16.vlgmr.msra.gmra.mxu1 %vm456_vm1, %v56_v59 }
  0x3c   :  { %933 = vmatprep.mubr.msk.bf16.mxu1 %vm1029_vm0, %v1028_v45  ;;  %918 = vmatpush3.bf16.msra.mxu1 %v991_v1 }
  0x3d   :  { %919 = vmatprep.subr.bf16.mxu1 %v1028_v45 }
  0x3e   :  { %885 = vmatpush3.bf16.msra.mxu0 %v981_v49 }
  0x3f   :  { %886 = vmatprep.subr.bf16.mxu0 %v982_v50 }
  0x40   :  { %920 = vmatpush3.bf16.msra.mxu1 %v992_v2 }
  0x41   :  { %921 = vmatprep.subr.bf16.mxu1 %v1028_v45 }
  0x42   :  { %887 = vmatpush3.bf16.msra.mxu0 %v983_v51 }
  0x43   :  { %888 = vmatprep.subr.bf16.mxu0 %v984_v52 }
  0x44   :  { %922 = vmatpush3.bf16.msra.mxu1 %v993_v3 }
  0x45   :  { %923 = vmatprep.subr.bf16.mxu1 %v1028_v45 }
  0x46   :  { %889 = vmatpush3.bf16.msra.mxu0 %v985_v53 }
  0x47   :  { %890 = vmatprep.subr.bf16.mxu0 %v986_v56 }
  0x48   :  { %924 = vmatpush3.bf16.msra.mxu1 %v994_v4 }
  0x49   :  { %925 = vmatprep.subr.bf16.mxu1 %v1028_v45 }
  0x4a   :  { %891 = vmatpush3.bf16.msra.mxu0 %v987_v60 }
  0x4b   :  { %892 = vmatprep.subr.bf16.mxu0 %v988_v61 }
  0x4c   :  { %926 = vmatpush3.bf16.msra.mxu1 %v995_v5 }
  0x4d   :  { %927 = vmatprep.subr.bf16.mxu1 %v1028_v45 }
  0x4e   :  { %893 = vmatpush3.bf16.msra.mxu0 %v989_v62 }
  0x50   :  { %928 = vmatpush3.bf16.msra.mxu1 %v996_v6 }
  0x51   :  { %573 = vmatmul.mubr.bf16.vlgmr.msra.gmra.mxu0 %v54_v0  ;;  %929 = vmatprep.subr.bf16.mxu1 %v1028_v45 }
  0x54   :  { %930 = vmatpush3.bf16.msra.mxu1 %v997_v7 }
  0x55   :  { %931 = vmatprep.subr.bf16.mxu1 %v1028_v45 }
  0x58   :  { %932 = vmatpush3.bf16.msra.mxu1 %v998_v8 }
  0xf1   :  { %v850_v9 = vpop.f32.mrf.mxu0 }
  0xf3   :  { %v851_v10 = vpop.f32.mrf.mxu0  ;;  %v872_v11 = vpop.f32.mrf.mxu1 }
  0xf4   :  { %v852_v21 = vadd.f32 %v851_v10, %v850_v9 }
  0xf5   :  { %v853_v12 = vpop.f32.mrf.mxu0  ;;  %v873_v13 = vpop.f32.mrf.mxu1 }
  0xf6   :  { %v495_v23 = vadd.f32 %v852_v21, %v771_v22  ;;  %v874_v24 = vadd.f32 %v873_v13, %v872_v11 }
  0xf7   :  { %v854_v14 = vpop.f32.mrf.mxu0  ;;  %v875_v15 = vpop.f32.mrf.mxu1 }
  0xf8   :  { %v535_v27 = vadd.f32 %v874_v24, %v495_v23 }
  0xf9   :  { %v876_v16 = vpop.f32.mrf.mxu1 }
  0xfb   :  { %v614_v17 = vpop.f32.mrf.mxu1 }
  0xfd   :  { %v915_v18 = vpop.f32.mrf.mxu1 }
  0xff   :  { %v617_v19 = vpop.f32.mrf.mxu1 }
 0x101   :  { %v916_v20 = vpop.f32.mrf.mxu1 }
 0x111   :  { %v894_v25 = vpop.f32.mrf.mxu0 }
 0x113   :  { %v895_v26 = vpop.f32.mrf.mxu0 }
 0x114   :  { %v896_v28 = vadd.f32 %v895_v26, %v894_v25 }
 0x115   :  { %v897_v29 = vpop.f32.mrf.mxu0 }
 0x116   :  { %v575_v30 = vadd.f32 %v896_v28, %v535_v27 }
 0x117   :  { %v898_v31 = vpop.f32.mrf.mxu0 }
 0x118   :  { %v615_v32 = vadd.f32 %v614_v17, %v575_v30 }
 0x11a   :  { %vm620_vm2 = vcmp.gt.f32.partialorder %v615_v32, 0.0  ;;  %v621_v33 = vmul.f32 0.1, %v615_v32 }
 0x11c   :  { %v622_v34 = vsel %vm620_vm2, %v615_v32, %v621_v33 }
 0x11d   :  { %v623_v35 = vpack.c.bf16 %v622_v34, %v622_v34 }
 0x11f   :  { %934 = vmatmul.mubr.bf16.vlgmr.msra.gmra.mxu1 %v623_v35 }
 0x1df   :  { %v729_v37 = vpop.f32.mrf.mxu1 }
 0x1e0   :  { %v730_v38 = vadd.f32 %v822_v36, %v729_v37 }
 0x1e1   :  { %v935_v39 = vpop.f32.mrf.mxu1 }
 0x1e2   :  { %v736_v40 = vmul.f32 0.1, %v730_v38  ;;  %vm735_vm3 = vcmp.gt.f32.partialorder %v730_v38, 0.0 }
 0x1e3   :  { %v732_v42 = vpop.f32.mrf.mxu1 }
 0x1e4   :  { %v737_v43 = vsel %vm735_vm3, %v730_v38, %v736_v40 }
 0x1e5   :  { %v936_v44 = vpop.f32.mrf.mxu1  ;;  %v745_v45 = vmul.f32 %v831_v41, %v737_v43 }
 0x1e7   :  { %v747_v46 = vsel %vm746_vm4, %v745_v45, 0.0 }
 0x1e8   :  { %748 = vadd.xlane.f32.xlu0 %v747_v46 }
 0x271   :  { %v749_v48 = vpop.xlane.xlu0 %748 }
 0x272   :  { %v757_v49 = vadd.f32 %v832_v47, %v749_v48 }
 0x274   :  { %v833_v50 = vmul.f32 -1.442695, %v757_v49 }
 0x276   :  { %999 = vpow2.f32 %v833_v50 }
 0x283   :  { %v1000_v51 = vpop.eup %999 }
 0x284   :  { %v761_v52 = vadd.f32 1.0, %v1000_v51 }
 0x286   :  { %1001 = vrcp.f32 %v761_v52 }
 0x293   :  { %v1002_v53 = vpop.eup %1001 }
 0x294   :  { %765 = vst.msk [vmem:[%s1153_s7] sm:$0xff] %vm764_vm5, %v1002_v53 }
 0x295   :  { %770 = vsyncpa [#allocation4], 1 }

</bundles_post_ra>
